<compile_context>
chip_gen: v7x
topology: tpu7x:2x2x1
jax: 0.10.0
libtpu: 0.0.40
codegen_flags: <defaults>
</compile_context>

<pallas_src>
import jax
import jax.numpy as jnp
from jax.experimental import pallas as pl
from jax.experimental.pallas import tpu as pltpu


def _fused_kernel(x_ref, w0_ref, w1_ref, w2_ref, o_ref):
    # x_ref : (TB, F1)   first half of the concat
    # w0_ref: (TB, F0)   second half of the concat (flattened w0)
    # w1_ref: (TB, F)    additive bias over the concatenated width, F = F1+F0
    # w2_ref: (TB, 1)    per-row scalar column (per-tile block)
    # o_ref : (TB, F)
    f1 = x_ref.shape[1]
    t2 = jnp.tanh(w2_ref[...])                      # (TB, 1), EUP

    if f1 % 128 == 0:
        # Lane-aligned split: write each half of the concatenation directly
        # into its lane range of the output (unmasked vst path, no XLU).
        o_ref[:, :f1] = jnp.tanh(x_ref[...] + w1_ref[:, :f1]) + t2
        o_ref[:, f1:] = jnp.tanh(w0_ref[...] + w1_ref[:, f1:]) + t2
    else:
        # Unaligned concat boundary: assemble in-register, one full-width
        # lane-dense store.
        # TODO(synk): replace with aligned prefix/suffix stores plus a single
        # masked store for the straddling 128-lane vreg if XLU/spill pressure
        # ever shows in the bundle (kernel is HBM-bound, so secondary).
        y = jnp.concatenate([x_ref[...], w0_ref[...]], axis=1)
        o_ref[...] = jnp.tanh(y + w1_ref[...]) + t2


def _vmem_capacity_bytes():
    try:
        info = pltpu.get_tpu_info()
        cap = getattr(info, "vmem_capacity_bytes", None)
        if cap:
            return int(cap)
    except Exception:
        pass
    return 128 << 20    # v5e / v6e default


def _round_up8(n):
    return ((n + 7) // 8) * 8


def fused_cat_add_tanh(x, w0, w1, w2, *, tile_b=None):
    """out = tanh(cat([x, w0.rs(B,-1)], 1) + w1.rs(B,-1)) + tanh(w2.rs(B,1))"""
    B, F1 = x.shape
    w0_flat = w0.reshape(w0.shape[0], -1)     # (B, F0)  -- glue reshape
    w1_flat = w1.reshape(w1.shape[0], -1)     # (B, F)   -- glue reshape
    w2_col = w2.reshape(w2.shape[0], 1)       # (B, 1)   -- glue reshape
    F0 = w0_flat.shape[1]
    F = F1 + F0
    assert w1_flat.shape == (B, F)
    assert w2_col.shape == (B, 1)

    itemsize = x.dtype.itemsize
    # Per-row HBM streaming traffic: x(F1) + w0(F0) + w1(F) reads + out(F) write.
    stream_row_bytes = 3 * F * itemsize
    # w2's (tile_b, 1) VMEM block is lane-padded to 128 lanes.
    w2_row_bytes = 128 * itemsize

    # Generation-aware budgets (v7x: 64 MiB VMEM/TC; v5e/v6e: 128 MiB).
    vmem_cap = _vmem_capacity_bytes()
    small_vmem = vmem_cap <= (64 << 20)
    target_block_bytes = (4 << 20) if small_vmem else (8 << 20)
    vmem_budget_bytes = max(16 << 20, int(vmem_cap * 0.6))

    b_ceil8 = _round_up8(B)
    if tile_b is None:
        by_target = target_block_bytes // max(1, F * itemsize)
        by_vmem = vmem_budget_bytes // max(1, 2 * (stream_row_bytes + w2_row_bytes))
        tile_b = max(8, (min(by_target, by_vmem) // 8) * 8)
        tile_b = min(tile_b, b_ceil8)
        # Aim for >= ~8 grid steps (steady-state double buffering; gives each
        # v7x TensorCore >= 4 steps), while keeping >= 64-row tiles so the
        # per-step overhead stays negligible.
        by_steps = _round_up8(pl.cdiv(B, 8))
        tile_b = min(tile_b, max(64, by_steps))
    tile_b = max(8, min(_round_up8(tile_b), b_ceil8))

    grid = (pl.cdiv(B, tile_b),)   # partial last block handled by Pallas masking

    # Scoped-VMEM limit: double-buffered streaming blocks + w2 blocks + headroom,
    # clamped to ~75% of this generation's physical VMEM (<= 96 MiB).
    # TODO(synk): for F so wide that even tile_b=8 exceeds the cap (v7x, 64 MiB),
    # add a lane-aligned "parallel" grid axis over the feature dimension.
    vmem_bytes = 2 * tile_b * (stream_row_bytes + w2_row_bytes) + (2 << 20)
    vmem_ceiling = min(int(vmem_cap * 3 // 4), 96 << 20)
    vmem_bytes = int(min(max(vmem_bytes, 16 << 20), vmem_ceiling))

    return pl.pallas_call(
        _fused_kernel,
        out_shape=jax.ShapeDtypeStruct((B, F), x.dtype),
        grid_spec=pltpu.PrefetchScalarGridSpec(
            num_scalar_prefetch=0,
            grid=grid,
            in_specs=[
                pl.BlockSpec((tile_b, F1), lambda i: (i, 0)),
                pl.BlockSpec((tile_b, F0), lambda i: (i, 0)),
                pl.BlockSpec((tile_b, F), lambda i: (i, 0)),
                pl.BlockSpec((tile_b, 1), lambda i: (i, 0)),
            ],
            out_specs=pl.BlockSpec((tile_b, F), lambda i: (i, 0)),
        ),
        compiler_params=pltpu.CompilerParams(
            dimension_semantics=("parallel",),
            vmem_limit_bytes=vmem_bytes),
    )(x, w0_flat, w1_flat, w2_col)


if __name__ == "__main__":
    key = jax.random.PRNGKey(0)
    k0, k1, k2, k3 = jax.random.split(key, 4)

    # Small, self-consistent shapes (x interpreted as 2-D so the concat
    # composes):
    #   B = 12 rows; x: (12, 256); w0: (12, 8, 4, 4) -> flattens to (12, 128)
    #   concat width F = 384; w1: (12, 384, 1, 1); w2: (12,)
    # B = 12 exercises the partial-last-block (masked) path with tile_b = 8.
    B, F1 = 12, 256
    C0, H0, W0 = 8, 4, 4
    F = F1 + C0 * H0 * W0

    x = jax.random.normal(k0, (B, F1), dtype=jnp.float32)
    w0 = jax.random.normal(k1, (B, C0, H0, W0), dtype=jnp.float32)
    w1 = jax.random.normal(k2, (B, F, 1, 1), dtype=jnp.float32)
    w2 = jax.random.normal(k3, (B,), dtype=jnp.float32)

    # Pure-JAX reference.
    y_ref = jnp.concatenate([x, w0.reshape(B, -1)], axis=1) + w1.reshape(B, -1)
    ref = jnp.tanh(y_ref) + jnp.tanh(w2.reshape(B, 1))

    # 1) Auto tile sizing.
    out = jax.block_until_ready(fused_cat_add_tanh(x, w0, w1, w2))
    assert out.shape == (B, F)
    assert jnp.allclose(out, ref, atol=1e-5, rtol=1e-5)

    # 2) Forced tile_b=8: multi-step grid with a partial (masked) last batch
    #    block (12 rows = 8 + 4).
    out2 = jax.block_until_ready(fused_cat_add_tanh(x, w0, w1, w2, tile_b=8))
    assert jnp.allclose(out2, ref, atol=1e-5, rtol=1e-5)

    print("KERNEL_OK")
</pallas_src>

<mosaic_0001>
module attributes {stable_mosaic.version = 11 : i64} {
  func.func @_fused_kernel(%arg0: i32, %arg1: memref<16x256xf32, #tpu.memory_space<vmem>>, %arg2: memref<16x128xf32, #tpu.memory_space<vmem>>, %arg3: memref<16x384xf32, #tpu.memory_space<vmem>>, %arg4: memref<16x1xf32, #tpu.memory_space<vmem>>, %arg5: memref<16x384xf32, #tpu.memory_space<vmem>>) attributes {dimension_semantics = [#tpu.dimension_semantics<parallel>], iteration_bounds = array<i64: 1>, scalar_prefetch = 0 : i64, scratch_operands = 0 : i64, tpu.core_type = #tpu.core_type<tc>, window_params = [{transform_indices = @transform_0, window_bounds = array<i64: 16, 256>}, {transform_indices = @transform_1, window_bounds = array<i64: 16, 128>}, {transform_indices = @transform_2, window_bounds = array<i64: 16, 384>}, {transform_indices = @transform_3, window_bounds = array<i64: 16, 1>}, {transform_indices = @transform_4, window_bounds = array<i64: 16, 384>}]} {
    %c0 = arith.constant 0 : index
    %c0_0 = arith.constant 0 : index
    %0 = vector.load %arg4[%c0, %c0_0] : memref<16x1xf32, #tpu.memory_space<vmem>>, vector<16x1xf32>
    %1 = math.tanh %0 : vector<16x1xf32>
    %c0_1 = arith.constant 0 : index
    %c0_2 = arith.constant 0 : index
    %2 = vector.load %arg1[%c0_1, %c0_2] : memref<16x256xf32, #tpu.memory_space<vmem>>, vector<16x256xf32>
    %c0_3 = arith.constant 0 : index
    %c0_4 = arith.constant 0 : index
    %3 = vector.load %arg3[%c0_3, %c0_4] : memref<16x384xf32, #tpu.memory_space<vmem>>, vector<16x256xf32>
    %4 = arith.addf %2, %3 : vector<16x256xf32>
    %5 = math.tanh %4 : vector<16x256xf32>
    %6 = vector.broadcast %1 : vector<16x1xf32> to vector<16x256xf32>
    %7 = arith.addf %5, %6 : vector<16x256xf32>
    %c0_5 = arith.constant 0 : index
    %c0_6 = arith.constant 0 : index
    %8 = vector.load %arg5[%c0_5, %c0_6] : memref<16x384xf32, #tpu.memory_space<vmem>>, vector<16x256xf32>
    tpu.vector_store %arg5[%c0_5, %c0_6], %7 {strides = array<i32>} : memref<16x384xf32, #tpu.memory_space<vmem>>, vector<16x256xf32>,
    %c0_7 = arith.constant 0 : index
    %c0_8 = arith.constant 0 : index
    %9 = vector.load %arg2[%c0_7, %c0_8] : memref<16x128xf32, #tpu.memory_space<vmem>>, vector<16x128xf32>
    %c0_9 = arith.constant 0 : index
    %c256 = arith.constant 256 : index
    %10 = vector.load %arg3[%c0_9, %c256] : memref<16x384xf32, #tpu.memory_space<vmem>>, vector<16x128xf32>
    %11 = arith.addf %9, %10 : vector<16x128xf32>
    %12 = math.tanh %11 : vector<16x128xf32>
    %13 = vector.broadcast %1 : vector<16x1xf32> to vector<16x128xf32>
    %14 = arith.addf %12, %13 : vector<16x128xf32>
    %c0_10 = arith.constant 0 : index
    %c256_11 = arith.constant 256 : index
    %15 = vector.load %arg5[%c0_10, %c256_11] : memref<16x384xf32, #tpu.memory_space<vmem>>, vector<16x128xf32>
    tpu.vector_store %arg5[%c0_10, %c256_11], %14 {strides = array<i32>} : memref<16x384xf32, #tpu.memory_space<vmem>>, vector<16x128xf32>,
    return
  }
  func.func @transform_0(%arg0: i32) -> (i32, i32) {
    %c0_i32 = arith.constant 0 : i32
    %c0_i32_0 = arith.constant 0 : i32
    return %arg0, %c0_i32 : i32, i32
  }
  func.func @transform_1(%arg0: i32) -> (i32, i32) {
    %c0_i32 = arith.constant 0 : i32
    %c0_i32_0 = arith.constant 0 : i32
    return %arg0, %c0_i32 : i32, i32
  }
  func.func @transform_2(%arg0: i32) -> (i32, i32) {
    %c0_i32 = arith.constant 0 : i32
    %c0_i32_0 = arith.constant 0 : i32
    return %arg0, %c0_i32 : i32, i32
  }
  func.func @transform_3(%arg0: i32) -> (i32, i32) {
    %c0_i32 = arith.constant 0 : i32
    %c0_i32_0 = arith.constant 0 : i32
    return %arg0, %c0_i32 : i32, i32
  }
  func.func @transform_4(%arg0: i32) -> (i32, i32) {
    %c0_i32 = arith.constant 0 : i32
    %c0_i32_0 = arith.constant 0 : i32
    return %arg0, %c0_i32 : i32, i32
  }
}

</mosaic_0001>

<bundles_post_ra>
// kernel: tpu_custom_call.1
= control target key start
LH: loop header
LB: loop body
LE: loop exit
PB: predicated region body
PF: predicated region fallthrough
CT: control target
= control target key end

     0   :  { %9 = vsyncpa [#allocation3], 0  ;;  %s298_s0 = inlined_call_operand.hbm [shape: f32[12,256], index: 0, kind: input, shape index: {}]   ;;  %s299_s1 = inlined_call_operand.vmem [shape: f32[12,128], index: 1, kind: input, shape index: {}]   ;;  %s300_s2 = inlined_call_operand.hbm [shape: f32[12,384], index: 2, kind: input, shape index: {}]   ;;  %s301_s3 = inlined_call_operand.vmem [shape: f32[12,1], index: 3, kind: input, shape index: {}]   ;;  %s302_s4 = inlined_call_operand.hbm [shape: f32[12,384], index: 4, kind: output, shape index: {}]  }
   0x1   :  { %10 = vsyncpa [#allocation6], 0 }
   0x2   :  { %11 = vsyncpa [#allocation4], 0  ;;  %s211_s15 = smov [#allocation2]   ;;  %s139_s19 = scalar_lea.hbm %s298_s0, 512 }
   0x3   :  { %s17_s16 = sshll.u32 %s211_s15, 4  ;;  %p140_p0 = scmp.ne.s32.totalorder %s298_s0, %s139_s19  ;;  %s18_s16 = int_to_ptr.vmem [resolvable:$true] %s17_s16 }
   0x4   :  { %p143_p1 = scmp.lt.u32.totalorder %s139_s19, %s298_s0 }
   0x6   :  { %p145_p2 = pnand %p143_p1, %p140_p0 }
   0x8   :  { %148 = shalt.err (!%p145_p2)
}
   0x9   :  { %s149_s24 = scalar_lea.vmem %s18_s16, 512  ;;  %p154_p4 = scmp.lt.s32.totalorder %s18_s16, %s18_s16 }
   0xa   :  { %p150_p3 = scmp.ne.s32.totalorder %s18_s16, %s149_s24  ;;  %p155_p5 = scmp.lt.s32.totalorder %s149_s24, %s149_s24 }
   0xc   :  { %p156_p6 = por %p155_p5, %p154_p4 }
   0xe   :  { %p157_p7 = pnand %p156_p6, %p150_p3 }
  0x10   :  { %160 = shalt.err (!%p157_p7)
}
  0x11   :  { %s212_s25 = smov 256   ;;  %s213_s26 = smov 16  }
  0x12   :  { %23 = dma.hbm_to_vmem [thread:$0]  %s298_s0, 512, %s18_s16, [#allocation3], %s212_s25, %s212_s25, %s213_s26  }
  0x13   :  { %s214_s29 = smov [#allocation5]   ;;  %s161_s7 = scalar_lea.hbm %s300_s2, 768 }
  0x14   :  { %s31_s30 = sshll.u32 %s214_s29, 4  ;;  %p162_p8 = scmp.ne.s32.totalorder %s300_s2, %s161_s7  ;;  %s32_s30 = int_to_ptr.vmem [resolvable:$true] %s31_s30 }
  0x15   :  { %p165_p9 = scmp.lt.u32.totalorder %s161_s7, %s300_s2 }
  0x17   :  { %p167_p10 = pnand %p165_p9, %p162_p8 }
  0x19   :  { %170 = shalt.err (!%p167_p10)
}
  0x1a   :  { %s171_s12 = scalar_lea.vmem %s32_s30, 768  ;;  %p176_p12 = scmp.lt.s32.totalorder %s32_s30, %s32_s30 }
  0x1b   :  { %p172_p11 = scmp.ne.s32.totalorder %s32_s30, %s171_s12  ;;  %p177_p13 = scmp.lt.s32.totalorder %s171_s12, %s171_s12 }
  0x1d   :  { %p178_p0 = por %p177_p13, %p176_p12 }
  0x1f   :  { %p179_p1 = pnand %p178_p0, %p172_p11 }
  0x21   :  { %182 = shalt.err (!%p179_p1)
}
  0x22   :  { %s215_s0 = smov 384   ;;  %s216_s13 = smov 24  }
  0x23   :  { %37 = dma.hbm_to_vmem [thread:$0]  %s300_s2, 768, %s32_s30, [#allocation6], %s215_s0, %s215_s0, %s216_s13  }
  0x24   :  { %205 = dma.done.wait [#allocation3], 512  }
  0x25   :  { %206 = vsyncadd [#allocation3], 4294966784 }
  0x26   :  { %207 = dma.done.wait [#allocation6], 768  }
  0x27   :  { %208 = vsyncadd [#allocation6], 4294966528  ;;  %v217_v0 = vmov 0   ;;  %v46_v1 = vld [vmem:[%s301_s3] sm:$0xff]  ;;  %v47_v2 = vld [vmem:[%s301_s3 + $0x8] sm:$0xff] }
  0x28   :  { %122 = vset.pattern.permute.xlu0 %v217_v0  ;;  %123 = vtanh.f32 %v46_v1  ;;  %v50_v5 = vld [vmem:[#allocation2] sm:$0xff]  ;;  %v51_v7 = vld [vmem:[#allocation2 + $0x8] sm:$0xff]  ;;  %v86_v10 = vld [vmem:[#allocation5 + $0x10] sm:$0xff] }
  0x29   :  { %125 = vtanh.f32 %v47_v2  ;;  %v54_v6 = vld [vmem:[#allocation5] sm:$0xff]  ;;  %v55_v8 = vld [vmem:[#allocation5 + $0x8] sm:$0xff]  ;;  %v52_v13 = vld [vmem:[#allocation2 + $0x10] sm:$0xff] }
  0x2a   :  { %v84_v9 = vld [vmem:[%s299_s1] sm:$0xff]  ;;  %v58_v11 = vadd.f32 %v54_v6, %v50_v5  ;;  %v59_v12 = vadd.f32 %v55_v8, %v51_v7  ;;  %v56_v14 = vld [vmem:[#allocation5 + $0x18] sm:$0xff]  ;;  %v85_v18 = vld [vmem:[%s299_s1 + $0x8] sm:$0xff]  ;;  %s218_s1 = smov [#allocation7]  }
  0x2b   :  { %v88_v15 = vadd.f32 %v86_v10, %v84_v9  ;;  %v53_v16 = vld [vmem:[#allocation2 + $0x18] sm:$0xff]  ;;  %v57_v17 = vld [vmem:[#allocation5 + $0x20] sm:$0xff]  ;;  %v87_v19 = vld [vmem:[#allocation5 + $0x28] sm:$0xff]  ;;  %v60_v20 = vadd.f32 %v56_v14, %v52_v13  ;;  %s101_s22 = sshll.u32 %s218_s1, 4  ;;  %s102_s22 = int_to_ptr.vmem [resolvable:$true] %s101_s22 }
  0x2c   :  { %127 = vtanh.f32 %v58_v11  ;;  %v61_v21 = vadd.f32 %v57_v17, %v53_v16  ;;  %v89_v22 = vadd.f32 %v87_v19, %v85_v18  ;;  %s183_s23 = scalar_lea.vmem %s102_s22, 768  ;;  %p188_p3 = scmp.lt.s32.totalorder %s102_s22, %s102_s22 }
  0x2d   :  { %129 = vtanh.f32 %v59_v12  ;;  %p184_p2 = scmp.ne.s32.totalorder %s102_s22, %s183_s23  ;;  %p189_p4 = scmp.lt.s32.totalorder %s183_s23, %s183_s23 }
  0x2e   :  { %131 = vtanh.f32 %v88_v15 }
  0x2f   :  { %133 = vtanh.f32 %v60_v20  ;;  %p190_p5 = por %p189_p4, %p188_p3 }
  0x30   :  { %135 = vtanh.f32 %v61_v21 }
  0x31   :  { %137 = vtanh.f32 %v89_v22  ;;  %p191_p6 = pnand %p190_p5, %p184_p2 }
  0x32   :  { %v124_v3 = vpop.eup %123 }
  0x33   :  { %68 = vperm.xlu0 %122, %v124_v3   ;;  %v126_v4 = vpop.eup %125 }
  0x36   :  { %v128_v23 = vpop.eup %127 }
  0x37   :  { %73 = vperm.xlu0 %122, %v126_v4   ;;  %v130_v24 = vpop.eup %129 }
  0x38   :  { %v132_v25 = vpop.eup %131 }
  0x39   :  { %v134_v26 = vpop.eup %133 }
  0x3a   :  { %v136_v28 = vpop.eup %135 }
  0x3b   :  { %v138_v32 = vpop.eup %137 }
  0xb2   :  { %v69_v27 = vpop.permute.xlu0 %68 }
  0xb3   :  { %v76_v29 = vadd.f32 %v128_v23, %v69_v27  ;;  %v77_v30 = vadd.f32 %v130_v24, %v69_v27  ;;  %v92_v31 = vadd.f32 %v132_v25, %v69_v27 }
  0xb5   :  { %80 = vst [vmem:[#allocation7] sm:$0xff] %v76_v29  ;;  %81 = vst [vmem:[#allocation7 + $0x8] sm:$0xff] %v77_v30 }
  0xb6   :  { %94 = vst [vmem:[#allocation7 + $0x10] sm:$0xff] %v92_v31  ;;  %v74_v33 = vpop.permute.xlu0 %73 }
  0xb7   :  { %v78_v34 = vadd.f32 %v134_v26, %v74_v33  ;;  %v79_v35 = vadd.f32 %v136_v28, %v74_v33  ;;  %v93_v36 = vadd.f32 %v138_v32, %v74_v33 }
  0xb9   :  { %82 = vst [vmem:[#allocation7 + $0x18] sm:$0xff] %v78_v34  ;;  %83 = vst [vmem:[#allocation7 + $0x20] sm:$0xff] %v79_v35 }
  0xba   :  { %95 = vst [vmem:[#allocation7 + $0x28] sm:$0xff] %v93_v36 }
  0xbb   :  { %194 = shalt.err (!%p191_p6)
}
  0xbc   :  { %s195_s26 = scalar_lea.hbm %s302_s4, 768 }
  0xbd   :  { %p196_p7 = scmp.ne.s32.totalorder %s302_s4, %s195_s26  ;;  %p199_p8 = scmp.lt.u32.totalorder %s195_s26, %s302_s4 }
  0xbf   :  { %p201_p9 = pnand %p199_p8, %p196_p7 }
  0xc1   :  { %204 = shalt.err (!%p201_p9)
}
  0xc2   :  { %107 = dma.vmem_to_hbm [thread:$0]  %s102_s22, 768, %s302_s4, [#allocation4], %s215_s0, %s215_s0, %s216_s13  }
  0xc3   :  { %209 = dma.done.wait [#allocation4], 768  }
  0xc4   :  { %210 = vsyncadd [#allocation4], 4294966528 }
  0xc5   :  { %111 = vsyncpa [#allocation3], 1 }
  0xc6   :  { %112 = vsyncpa [#allocation6], 1 }
  0xc7   :  { %113 = vsyncpa [#allocation4], 1 }

</bundles_post_ra>
